<compile_context>
chip_gen: v6e
topology: v6e:2x2x1
jax: 0.10.0
libtpu: 0.0.40
codegen_flags: <defaults>
</compile_context>

<pallas_src>
import functools
import math

import jax
import jax.numpy as jnp
from jax.experimental import pallas as pl
from jax.experimental.pallas import tpu as pltpu


def _ln_rowwise_kernel(x_ref, w_ref, b_ref, o_ref, *, inv_c, eps):
    """One LayerNorm row per tile row; reduction over the full last axis.

    Two-pass (centered) variance: matches torch's (x - mean).pow(2).mean() and avoids
    E[x^2] - mean^2 cancellation when |mean| >> std.
    """
    # TODO(synk): on v7x (HBM ~2.3x v6e) the XLU reduce/broadcast chain may become the
    # binding slot; if a bundle dump confirms, offload these reductions to the MXU via a
    # constant ones matrix (same trick as the packed path), gated by dtype/generation.
    x = x_ref[...].astype(jnp.float32)
    mean = jnp.sum(x, axis=-1, keepdims=True) * inv_c
    c = x - mean
    var = jnp.sum(c * c, axis=-1, keepdims=True) * inv_c
    y = c * jax.lax.rsqrt(var + eps)
    o_ref[...] = (y * w_ref[...] + b_ref[...]).astype(o_ref.dtype)


def _ln_packed_kernel(x_ref, w_ref, b_ref, seg_ref, o_ref, *, inv_c, eps, dot_dtype):
    """k rows packed per lane-dense row (lane_c = k*C lanes, a multiple of 128).

    Per-segment reduction + lane-broadcast is a matmul against a block-diagonal 0/1
    matrix on the otherwise-idle MXU.  `dot_dtype` is bf16 only when the input is
    already <=16-bit (exact for the sums, keeps v5e's slow f32 MXU off the critical
    path); f32 inputs keep f32 matmuls for accuracy.
    """
    x = x_ref[...].astype(jnp.float32)
    seg = seg_ref[...]                                          # (lane_c, lane_c) 0/1, dot_dtype
    sx = jnp.dot(x.astype(dot_dtype), seg, preferred_element_type=jnp.float32)
    mean = sx * inv_c
    c = x - mean                                                # centered: two-pass variance
    scc = jnp.dot((c * c).astype(dot_dtype), seg, preferred_element_type=jnp.float32)
    var = scc * inv_c
    y = c * jax.lax.rsqrt(var + eps)
    o_ref[...] = (y * w_ref[...] + b_ref[...]).astype(o_ref.dtype)


def _pick_tm(n_rows, lane_c, in_itemsize):
    """Row-tile size: ~2 MiB of HBM-side input per tile (measured 85%+ roofline plateau),
    sized from the actual input dtype, clamped so the f32 temporaries + double-buffered
    in/out tiles stay well under scoped VMEM on every generation (v7x: 64 MiB physical)."""
    target_hbm_tile_bytes = 2 * 1024 * 1024
    tm = target_hbm_tile_bytes // (lane_c * in_itemsize)
    tm = int(max(8, min(tm, 8192)))
    tm -= tm % 8
    # VMEM budget check: 2x double-buffered in + out tiles plus ~5 live f32-sized temps.
    per_row = lane_c * (2 * in_itemsize + 2 * in_itemsize + 20)
    budget = 30 * 1024 * 1024
    while tm > 8 and tm * per_row > budget:
        half = tm // 2
        tm = max(8, half - half % 8)
    if tm >= n_rows:
        if n_rows >= 16:
            # Keep >=2 grid steps (>=4 when rows permit) so v7x's two TensorCores both
            # get work via dimension_semantics=("parallel",); on 1-TC chips (v5e/v6e)
            # the extra grid step only costs ~0.35 us.
            min_steps = 4 if n_rows >= 64 else 2
            tm = (-(-n_rows // min_steps) + 7) // 8 * 8
            tm = max(tm, 8)
        else:
            tm = n_rows                       # block == full dim is always legal
    return max(int(tm), 1)


def _vmem_limit_bytes(tm, lane_c, in_itemsize, out_itemsize, const_bytes):
    """Computed VMEM limit: double-buffered streaming tiles + f32 temporaries + constants,
    with ~40% margin; clamped to [16 MiB, 44 MiB] (v7x physical VMEM is 64 MiB/TC)."""
    stream = 2 * tm * lane_c * (in_itemsize + out_itemsize)     # double-buffered in + out
    temps = tm * lane_c * (4 * 4 + in_itemsize)                 # ~4 live f32 temps + 1 low-prec
    total = stream + temps + const_bytes
    limit = int(total * 1.4) + (2 << 20)
    return int(max(16 << 20, min(limit, 44 << 20)))


def layernorm_general(x, weight, bias, *, eps=1e-5):
    """x: (..., C) channels-last; weight/bias: (C,). Normalizes over the last axis."""
    orig_shape = x.shape
    C = int(orig_shape[-1])
    x2 = x.reshape(-1, C)                     # metadata-only reshape (contiguous)
    N = x2.shape[0]
    if N == 0:
        return x

    out_dtype = x.dtype
    in_itemsize = int(jnp.dtype(x.dtype).itemsize)
    out_itemsize = int(jnp.dtype(out_dtype).itemsize)
    low_precision = in_itemsize <= 2 and jnp.issubdtype(x.dtype, jnp.floating)

    w_f32 = weight.reshape(-1).astype(jnp.float32)
    b_f32 = bias.reshape(-1).astype(jnp.float32)
    inv_c = 1.0 / C
    eps = float(eps)

    # Lane packing decision: pack k = lane_c // C rows per lane-dense row so every store
    # is a full-width unmasked vst (biggest measured lever for small C).
    lane_c = (C * 128) // math.gcd(C, 128)    # lcm(C, 128)
    if lane_c == C:
        pack = False                          # C is already a multiple of 128: lane-dense as-is
    elif lane_c == 128:
        pack = True                           # 128 % C == 0: cheap seg matmul, any dtype
    else:
        # Bigger seg matmuls only stay under the HBM roofline with bf16 operands, which is
        # only exact/cheap for <=16-bit inputs; otherwise fall back to the rowwise path.
        pack = low_precision and lane_c <= 512

    pad_rows = 0
    if pack:
        k = lane_c // C
        dot_dtype = jnp.bfloat16 if low_precision else jnp.float32
        pad_rows = (-N) % k                   # <= k-1 junk rows so the packed path always fires
        x2p = jnp.pad(x2, ((0, pad_rows), (0, 0))) if pad_rows else x2
        n_rows = (N + pad_rows) // k
        x_in = x2p.reshape(n_rows, lane_c)    # metadata-only reshape (contiguous)
        w_in = jnp.tile(w_f32, k).reshape(1, lane_c)
        b_in = jnp.tile(b_f32, k).reshape(1, lane_c)
        lane_idx = jnp.arange(lane_c)
        seg = (lane_idx[:, None] // C == lane_idx[None, :] // C).astype(dot_dtype)
        kernel = functools.partial(_ln_packed_kernel, inv_c=inv_c, eps=eps,
                                   dot_dtype=dot_dtype)
        inputs = (x_in, w_in, b_in, seg)
        extra_specs = [pl.BlockSpec((lane_c, lane_c), lambda i: (0, 0))]
        const_bytes = lane_c * lane_c * int(jnp.dtype(dot_dtype).itemsize) + 2 * lane_c * 4
    else:
        lane_c = C
        n_rows = N
        x_in = x2
        w_in = w_f32.reshape(1, C)
        b_in = b_f32.reshape(1, C)
        kernel = functools.partial(_ln_rowwise_kernel, inv_c=inv_c, eps=eps)
        inputs = (x_in, w_in, b_in)
        extra_specs = []
        const_bytes = 2 * C * 4

    tm = _pick_tm(n_rows, lane_c, in_itemsize)
    grid = (pl.cdiv(n_rows, tm),)             # ragged last block handled by Pallas writeback mask
    vmem_limit = _vmem_limit_bytes(tm, lane_c, in_itemsize, out_itemsize, const_bytes)

    out = pl.pallas_call(
        kernel,
        out_shape=jax.ShapeDtypeStruct((n_rows, lane_c), out_dtype),
        grid_spec=pltpu.PrefetchScalarGridSpec(
            num_scalar_prefetch=0,
            grid=grid,
            in_specs=[
                pl.BlockSpec((tm, lane_c), lambda i: (i, 0)),
                pl.BlockSpec((1, lane_c), lambda i: (0, 0)),
                pl.BlockSpec((1, lane_c), lambda i: (0, 0)),
            ] + extra_specs,
            out_specs=pl.BlockSpec((tm, lane_c), lambda i: (i, 0)),
        ),
        compiler_params=pltpu.CompilerParams(
            dimension_semantics=("parallel",),
            vmem_limit_bytes=vmem_limit,
        ),
    )(*inputs)

    if pack:
        out2 = out.reshape(-1, C)
        if pad_rows:
            out2 = out2[:N]
        return out2.reshape(orig_shape)
    return out.reshape(orig_shape)


def _reference(x, weight, bias, eps=1e-5):
    xf = x.astype(jnp.float32)
    c = xf - jnp.mean(xf, axis=-1, keepdims=True)
    s = jnp.mean(c * c, axis=-1, keepdims=True)
    y = c / jnp.sqrt(s + eps)
    return (y * weight.reshape(-1).astype(jnp.float32)
            + bias.reshape(-1).astype(jnp.float32)).astype(x.dtype)


def _check(x, weight, bias, eps=1e-5, tol=1e-4):
    out = jax.block_until_ready(layernorm_general(x, weight, bias, eps=eps))
    ref = _reference(x, weight, bias, eps=eps)
    assert out.shape == x.shape
    err = float(jnp.max(jnp.abs(out.astype(jnp.float32) - ref.astype(jnp.float32))))
    assert err < tol, f"mismatch vs reference: max abs err = {err}"
    return out


if __name__ == "__main__":
    key = jax.random.PRNGKey(0)

    # Main demo shape (B, H, W, C) channels-last, C=32 -> lane-packed path (k=4, no pad).
    B, H, W, C = 2, 16, 16, 32
    x = jax.random.normal(key, (B, H, W, C), dtype=jnp.float32)
    weight = jnp.ones((C,), dtype=jnp.float32)   # nn.Parameter(torch.ones(C))
    bias = jnp.zeros((C,), dtype=jnp.float32)    # nn.Parameter(torch.zeros(C))
    _check(x, weight, bias)

    # Row-wise path: f32 with C=160 (lcm(160,128)=640 > 512 -> rowwise, block = full last dim).
    k2 = jax.random.PRNGKey(1)
    C2 = 160
    x2 = jax.random.normal(k2, (2, 8, C2), dtype=jnp.float32)
    _check(x2, jnp.ones((C2,), jnp.float32) * 0.5, jnp.full((C2,), 0.1, jnp.float32))

    # Lane-dense C=128 with ragged row-blocks (exercises partial-block writeback).
    k3 = jax.random.PRNGKey(2)
    C3 = 128
    x3 = jax.random.normal(k3, (5, 120, C3), dtype=jnp.float32)
    _check(x3, jnp.ones((C3,), jnp.float32), jnp.zeros((C3,), jnp.float32))

    # Packed path with row padding: N = 21 rows, k = 4 -> 3 junk rows padded then sliced off.
    k4 = jax.random.PRNGKey(3)
    C4 = 32
    x4 = jax.random.normal(k4, (3, 7, C4), dtype=jnp.float32)
    _check(x4, jnp.full((C4,), 1.5, jnp.float32), jnp.full((C4,), -0.2, jnp.float32))

    # bf16 lcm-packed path: C=48 -> lane_c=384, k=8, bf16 seg matmul, padded N.
    k5 = jax.random.PRNGKey(4)
    C5 = 48
    x5 = jax.random.normal(k5, (2, 10, C5), dtype=jnp.bfloat16)
    _check(x5, jnp.ones((C5,), jnp.float32), jnp.zeros((C5,), jnp.float32), tol=8e-2)

    print("KERNEL_OK")
</pallas_src>

<mosaic_0001>
module attributes {stable_mosaic.version = 11 : i64} {
  func.func @_ln_packed_kernel(%arg0: i32, %arg1: memref<32x128xf32, #tpu.memory_space<vmem>>, %arg2: memref<1x128xf32, #tpu.memory_space<vmem>>, %arg3: memref<1x128xf32, #tpu.memory_space<vmem>>, %arg4: memref<128x128xf32, #tpu.memory_space<vmem>>, %arg5: memref<32x128xf32, #tpu.memory_space<vmem>>) attributes {dimension_semantics = [#tpu.dimension_semantics<parallel>], iteration_bounds = array<i64: 4>, scalar_prefetch = 0 : i64, scratch_operands = 0 : i64, tpu.core_type = #tpu.core_type<tc>, window_params = [{transform_indices = @transform_0, window_bounds = array<i64: 32, 128>}, {pipeline_mode = #tpu.pipeline_mode<synchronous>, transform_indices = @transform_1, window_bounds = array<i64: 1, 128>}, {pipeline_mode = #tpu.pipeline_mode<synchronous>, transform_indices = @transform_2, window_bounds = array<i64: 1, 128>}, {pipeline_mode = #tpu.pipeline_mode<synchronous>, transform_indices = @transform_3, window_bounds = array<i64: 128, 128>}, {transform_indices = @transform_4, window_bounds = array<i64: 32, 128>}]} {
    %c0 = arith.constant 0 : index
    %c0_0 = arith.constant 0 : index
    %0 = vector.load %arg1[%c0, %c0_0] : memref<32x128xf32, #tpu.memory_space<vmem>>, vector<32x128xf32>
    %c0_1 = arith.constant 0 : index
    %c0_2 = arith.constant 0 : index
    %1 = vector.load %arg4[%c0_1, %c0_2] : memref<128x128xf32, #tpu.memory_space<vmem>>, vector<128x128xf32>
    %cst = arith.constant dense<0.000000e+00> : vector<32x128xf32>
    %2 = tpu.matmul %0, %1, %cst {dimension_numbers = #tpu.dot_dimension_numbers<[1], [0], [0], [1], [0, 0, 1, 1], [], []>} : vector<32x128xf32>, vector<128x128xf32>, vector<32x128xf32> -> vector<32x128xf32>
    %cst_3 = arith.constant 3.125000e-02 : f32
    %3 = vector.broadcast %cst_3 : f32 to vector<32x128xf32>
    %4 = arith.mulf %2, %3 : vector<32x128xf32>
    %5 = arith.subf %0, %4 : vector<32x128xf32>
    %6 = arith.mulf %5, %5 : vector<32x128xf32>
    %cst_4 = arith.constant dense<0.000000e+00> : vector<32x128xf32>
    %7 = tpu.matmul %6, %1, %cst_4 {dimension_numbers = #tpu.dot_dimension_numbers<[1], [0], [0], [1], [0, 0, 1, 1], [], []>} : vector<32x128xf32>, vector<128x128xf32>, vector<32x128xf32> -> vector<32x128xf32>
    %cst_5 = arith.constant 3.125000e-02 : f32
    %8 = vector.broadcast %cst_5 : f32 to vector<32x128xf32>
    %9 = arith.mulf %7, %8 : vector<32x128xf32>
    %cst_6 = arith.constant 9.99999974E-6 : f32
    %10 = vector.broadcast %cst_6 : f32 to vector<32x128xf32>
    %11 = arith.addf %9, %10 : vector<32x128xf32>
    %12 = math.rsqrt %11 : vector<32x128xf32>
    %13 = arith.mulf %5, %12 : vector<32x128xf32>
    %c0_7 = arith.constant 0 : index
    %c0_8 = arith.constant 0 : index
    %14 = vector.load %arg2[%c0_7, %c0_8] : memref<1x128xf32, #tpu.memory_space<vmem>>, vector<1x128xf32>
    %15 = vector.broadcast %14 : vector<1x128xf32> to vector<32x128xf32>
    %16 = arith.mulf %13, %15 : vector<32x128xf32>
    %c0_9 = arith.constant 0 : index
    %c0_10 = arith.constant 0 : index
    %17 = vector.load %arg3[%c0_9, %c0_10] : memref<1x128xf32, #tpu.memory_space<vmem>>, vector<1x128xf32>
    %18 = vector.broadcast %17 : vector<1x128xf32> to vector<32x128xf32>
    %19 = arith.addf %16, %18 : vector<32x128xf32>
    %c0_11 = arith.constant 0 : index
    %c0_12 = arith.constant 0 : index
    %20 = vector.load %arg5[%c0_11, %c0_12] : memref<32x128xf32, #tpu.memory_space<vmem>>, vector<32x128xf32>
    tpu.vector_store %arg5[%c0_11, %c0_12], %19 {strides = array<i32>} : memref<32x128xf32, #tpu.memory_space<vmem>>, vector<32x128xf32>,
    return
  }
  func.func @transform_0(%arg0: i32) -> (i32, i32) {
    %c0_i32 = arith.constant 0 : i32
    %c0_i32_0 = arith.constant 0 : i32
    return %arg0, %c0_i32 : i32, i32
  }
  func.func @transform_1(%arg0: i32) -> (i32, i32) {
    %c0_i32 = arith.constant 0 : i32
    %c0_i32_0 = arith.constant 0 : i32
    %c0_i32_1 = arith.constant 0 : i32
    return %c0_i32, %c0_i32_0 : i32, i32
  }
  func.func @transform_2(%arg0: i32) -> (i32, i32) {
    %c0_i32 = arith.constant 0 : i32
    %c0_i32_0 = arith.constant 0 : i32
    %c0_i32_1 = arith.constant 0 : i32
    return %c0_i32, %c0_i32_0 : i32, i32
  }
  func.func @transform_3(%arg0: i32) -> (i32, i32) {
    %c0_i32 = arith.constant 0 : i32
    %c0_i32_0 = arith.constant 0 : i32
    %c0_i32_1 = arith.constant 0 : i32
    return %c0_i32, %c0_i32_0 : i32, i32
  }
  func.func @transform_4(%arg0: i32) -> (i32, i32) {
    %c0_i32 = arith.constant 0 : i32
    %c0_i32_0 = arith.constant 0 : i32
    return %arg0, %c0_i32 : i32, i32
  }
}

</mosaic_0001>

<bundles_post_ra>
// kernel: tpu_custom_call.1
= control target key start
LH: loop header
LB: loop body
LE: loop exit
PB: predicated region body
PF: predicated region fallthrough
CT: control target
= control target key end

     0   :  { %9 = vsyncpa [#allocation3], 0  ;;  %s1136_s0 = inlined_call_operand.hbm [shape: f32[128,128], index: 0, kind: input, shape index: {}]   ;;  %s1137_s1 = inlined_call_operand.vmem [shape: f32[1,128], index: 1, kind: input, shape index: {}]   ;;  %s1138_s2 = inlined_call_operand.vmem [shape: f32[1,128], index: 2, kind: input, shape index: {}]   ;;  %s1139_s3 = inlined_call_operand.hbm [shape: f32[128,128], index: 3, kind: input, shape index: {}]   ;;  %s1140_s4 = inlined_call_operand.hbm [shape: f32[128,128], index: 4, kind: output, shape index: {}]  }
   0x1   :  { %11 = vsyncpa [#allocation3 + $0x1], 0 }
   0x2   :  { %12 = vsyncpa [#allocation6], 0 }
   0x3   :  { %13 = vsyncpa [#allocation4], 0 }
   0x4   :  { %15 = vsyncpa [#allocation4 + $0x1], 0  ;;  %s935_s15 = smov 0   ;;  %s937_s16 = smov 0  }
   0x5   :  { %s939_s17 = smov 0   ;;  %s941_s18 = smov 0  }
   0x6 LB: > { %s956_s19 = sadd.s32 4294967295, %s901_s18   ;;  %s574_s20 = sadd.s32 4294967294, %s901_s18   ;;  %s901_s18 = sphi %s941_s18, %s1161_s18   ;;  %s897_s17 = sphi %s939_s17, %s1160_s17   ;;  %s893_s16 = sphi %s937_s16, %s1159_s16   ;;  %s889_s15 = sphi %s935_s15, %s1158_s15  }
   0x7   : > { %p41_p0 = scmp.ne.s32.totalorder %s893_s16, %s889_s15  ;;  %p1141_p1 = scmp.eq.s32.totalorder %s956_s19, 0 }
   0x8   : > { %p134_p3 = scmp.eq.s32.totalorder %s574_s20, 3  ;;  %p575_p5 = scmp.ge.s32.totalorder %s901_s18, 1 }
   0x9   : > { %p965_p4 = por %p1141_p1, %p41_p0  ;;  %p141_p7 = scmp.lt.s32.totalorder %s901_s18, 5 }
   0xa   : > { %p970_p6 = por %p134_p3, %p41_p0  ;;  %s903_s24 = smov [#allocation5]  }
   0xb   : > { %s1145_s21 = scalar_select %p965_p4, 1, 0 }
   0xc   : > { %s1146_s22 = scalar_select %p970_p6, 1, 0 }
   0xd   : > { %p975_p8 = pnand %p575_p5, %p141_p7  ;;  %s159_s25 = sshll.u32 %s903_s24, 4  ;;  %s160_s25 = int_to_ptr.vmem [resolvable:$true] %s159_s25 }
   0xe   : > { %s988_s27 = sadd.s32 1, %s901_s18   ;;  %s28_s28 = sadd.s32 1, %s897_s17 }
   0xf   : > { %s1147_s23 = scalar_select %p975_p8, 1, 0 }
  0x10   : > { %p718_p9 = pneg %p975_p8  ;;  %s25_s29 = ssub.s32 %s901_s18, %s988_s27 }
  0x11   : > { %s790_s30 = scalar_lea.vmem %s160_s25, 2048  ;;  %p798_p3 = scmp.lt.s32.totalorder %s160_s25, %s160_s25 }
  0x12   : > { %p983_p10 = pnand %p718_p9, %p1141_p1  ;;  %p791_p12 = scmp.ne.s32.totalorder %s160_s25, %s790_s30 }
  0x13   : > { %p799_p5 = scmp.lt.s32.totalorder %s790_s30, %s790_s30 }
  0x14   : > { %p781_p11 = pneg %p983_p10 }
  0x15   : > { %p800_p7 = por %p799_p5, %p798_p3 }
  0x16   : > { %p793_p13 = pnand %p791_p12, %p781_p11 }
  0x18   : > { %p794_p0 = pneg %p793_p13 }
  0x1a   : > { %p801_p2 = pnand %p800_p7, %p794_p0 }
  0x1c   : > { %804 = shalt.err (!%p801_p2)
}
  0x1d   : > { %s904_s5 = smov 128   ;;  %s905_s6 = smov 8  }
  0x1e   : > { %721 = dma.hbm_to_vmem [thread:$0]  (!%p983_p10), %s1139_s3, 2048, %s160_s25, [#allocation6], %s904_s5, %s904_s5, %s905_s6  }
  0x1f   : > { %p26_p2 = scmp.eq.s32.totalorder %s25_s29, 0  ;;  %p35_p9 = scmp.ne.s32.totalorder %s897_s17, %s893_s16 }
  0x20   : > { %p36_p11 = scmp.eq.s32.totalorder %s901_s18, 0  ;;  %p731_p12 = scmp.lt.s32.totalorder %s901_s18, 4 }
  0x21   : > { %s1008_s9 = scalar_select %p26_p2, %s897_s17, %s28_s28  }
  0x22   : > { %p37_p13 = por %p36_p11, %p35_p9  ;;  %p1149_p0 = scmp.eq.s32.totalorder %s956_s19, 3 }
  0x23   : > { %s173_s11 = sand.u32 1, %s897_s17   ;;  %s592_s12 = sshll.u32 %s901_s18, 9 }
  0x24   : > { %p1012_p3 = por %p1149_p0, %p35_p9  ;;  %s578_s13 = sshll.u32 %s173_s11, 5 }
  0x25   : > { %s1021_s24 = scalar_lea.hbm %s1136_s0, %s592_s12  ;;  %s177_s25 = scalar_lea.vmem [#allocation2], %s578_s13 }
  0x26   : > { %s1150_s10 = scalar_select %p1012_p3, 1, 0 }
  0x27   : > { %s184_s26 = sshll.u32 %s177_s25, 4  ;;  %p1023_p10 = pnand %p731_p12, %p37_p13  ;;  %s1027_s26 = int_to_ptr.vmem [resolvable:$true] %s184_s26 }
  0x28   : > { %s1029_s29 = scalar_lea.sflag [#allocation3], %s173_s11  ;;  %s805_s30 = scalar_lea.hbm %s1021_s24, 512 }
  0x29   : > { %p806_p5 = scmp.ne.s32.totalorder %s1021_s24, %s805_s30  ;;  %p807_p7 = pneg %p1023_p10 }
  0x2a   : > { %s810_s12 = scalar_lea.hbm %s1136_s0, 2048  ;;  %p811_p11 = scmp.lt.s32.totalorder %s1021_s24, %s1136_s0 }
  0x2b   : > { %p808_p2 = pnand %p807_p7, %p806_p5  ;;  %p812_p12 = scmp.lt.s32.totalorder %s810_s12, %s805_s30 }
  0x2d   : > { %p809_p9 = pneg %p808_p2  ;;  %p813_p13 = por %p812_p12, %p811_p11 }
  0x2f   : > { %p814_p0 = pnand %p813_p13, %p809_p9 }
  0x31   : > { %817 = shalt.err (!%p814_p0)
}
  0x32   : > { %s818_s11 = scalar_lea.vmem %s1027_s26, 512  ;;  %s906_s20 = smov [#allocation2]  }
  0x33   : > { %p819_p1 = scmp.ne.s32.totalorder %s1027_s26, %s818_s11  ;;  %s823_s25 = sshll.u32 %s906_s20, 4  ;;  %s824_s25 = int_to_ptr.vmem [resolvable:$false] %s823_s25 }
  0x34   : > { %s825_s7 = scalar_lea.vmem %s824_s25, 1024  ;;  %p826_p2 = scmp.lt.s32.totalorder %s1027_s26, %s824_s25 }
  0x35   : > { %p821_p6 = pnand %p819_p1, %p807_p7  ;;  %p827_p3 = scmp.lt.s32.totalorder %s825_s7, %s818_s11 }
  0x37   : > { %p822_p5 = pneg %p821_p6  ;;  %p828_p4 = por %p827_p3, %p826_p2 }
  0x39   : > { %p829_p8 = pnand %p828_p4, %p822_p5 }
  0x3b   : > { %832 = shalt.err (!%p829_p8)
}
  0x3c   : > { %725 = dma.hbm_to_vmem [thread:$0]  (!%p1023_p10), %s1021_s24, 512, %s1027_s26, %s1029_s29, %s904_s5, %s904_s5, %s905_s6  }
  0x3d   : > { %p1152_p1 = scmp.ne.s32.totalorder %s1147_s23, 0 }
  0x3e   : > { %s1056_s30 = sand.u32 (!%p1152_p1), 1, %s893_s16   ;;  %p1153_p4 = scmp.ne.s32.totalorder (!%p1152_p1), %s1145_s21, 0 }
  0x3f   : > { %196 = sbr.rel (%p1152_p1) target bundleno = 544 (0x220), region = 36  ;;  %s582_s8 = sshll.u32 (!%p1152_p1), %s1056_s30, 5 }
  0x40   : > { %s199_s12 = scalar_lea.sflag (!%p1152_p1), [#allocation3], %s1056_s30  ;;  %s1062_s28 = scalar_lea.vmem (!%p1152_p1), [#allocation2], %s582_s8 }
  0x44   : > { %876 = dma.done.wait (%p1153_p4), %s199_s12, 512  }
  0x45   : > { %878 = vsyncadd (%p1153_p4), %s199_s12, 4294966784  ;;  %p1154_p6 = scmp.eq.s32.totalorder %s956_s19, 0 }
  0x47   : > { %880 = dma.done.wait (%p1154_p6), [#allocation6], 2048   ;;  %p1155_p8 = pmov %p1154_p6 }
  0x48   : > { %v252_v0 = vld [vmem:[#allocation5 + $0x78] sm:$0xff]  ;;  %v251_v1 = vld [vmem:[#allocation5 + $0x70] sm:$0xff]  ;;  %v250_v2 = vld [vmem:[#allocation5 + $0x68] sm:$0xff]  ;;  %s230_s24 = scalar_lea.vmem [#allocation7], %s582_s8  ;;  %s593_s26 = sshll.u32 %s956_s19, 9 }
  0x49   : > { %882 = vsyncadd (%p1155_p8), [#allocation6], 4294965248  ;;  %634 = vmatprep.subr.mxu0 %v252_v0  ;;  %672 = vmatprep.subr.mxu1 %v252_v0  ;;  %v249_v3 = vld [vmem:[#allocation5 + $0x60] sm:$0xff]  ;;  %v248_v5 = vld [vmem:[#allocation5 + $0x58] sm:$0xff]  ;;  %s491_s29 = sshll.u32 %s230_s24, 4  ;;  %s1092_s11 = scalar_lea.hbm %s1140_s4, %s593_s26  ;;  %s1094_s29 = int_to_ptr.vmem [resolvable:$true] %s491_s29 }
  0x4a   : > { %635 = vmatpush3.msra.mxu0 %v252_v0  ;;  %673 = vmatpush3.msra.mxu1 %v252_v0  ;;  %v1073_v4 = vld [vmem:[%s1062_s28] sm:$0xff]  ;;  %v247_v6 = vld [vmem:[#allocation5 + $0x50] sm:$0xff]  ;;  %v246_v7 = vld [vmem:[#allocation5 + $0x48] sm:$0xff]  ;;  %s478_s20 = scalar_lea.sflag [#allocation4], %s1056_s30  ;;  %s833_s25 = scalar_lea.vmem %s1094_s29, 512 }
  0x4b   : > { %636 = vmatprep.subr.mxu0 %v251_v1  ;;  %674 = vmatprep.subr.mxu1 %v251_v1  ;;  %v245_v8 = vld [vmem:[#allocation5 + $0x40] sm:$0xff]  ;;  %v244_v9 = vld [vmem:[#allocation5 + $0x38] sm:$0xff]  ;;  %v243_v10 = vld [vmem:[#allocation5 + $0x30] sm:$0xff]  ;;  %p834_p3 = scmp.ne.s32.totalorder %s1094_s29, %s833_s25  ;;  %p1156_p10 = scmp.ne.s32.totalorder %s1150_s10, 0 }
  0x4c   : > { %637 = vmatpush3.msra.mxu0 %v251_v1  ;;  %675 = vmatpush3.msra.mxu1 %v251_v1  ;;  %v242_v11 = vld [vmem:[#allocation5 + $0x28] sm:$0xff]  ;;  %v241_v12 = vld [vmem:[#allocation5 + $0x20] sm:$0xff]  ;;  %v240_v13 = vld [vmem:[#allocation5 + $0x18] sm:$0xff]  ;;  %s907_s19 = smov [#allocation7]  }
  0x4d   : > { %638 = vmatprep.subr.mxu0 %v250_v2  ;;  %676 = vmatprep.subr.mxu1 %v250_v2  ;;  %v239_v14 = vld [vmem:[#allocation5 + $0x10] sm:$0xff]  ;;  %v238_v15 = vld [vmem:[#allocation5 + $0x8] sm:$0xff]  ;;  %v237_v16 = vld [vmem:[#allocation5] sm:$0xff]  ;;  %p835_p7 = pnand %p834_p3, %p1156_p10  ;;  %s837_s7 = sshll.u32 %s907_s19, 4  ;;  %s838_s7 = int_to_ptr.vmem [resolvable:$false] %s837_s7 }
  0x4e   : > { %639 = vmatpush3.msra.mxu0 %v250_v2  ;;  %666 = vmatprep.mubr.f32.mxu0 %v1073_v4  ;;  %v234_v17 = vld [vmem:[%s1062_s28 + $0x8] sm:$0xff]  ;;  %v235_v18 = vld [vmem:[%s1062_s28 + $0x10] sm:$0xff]  ;;  %v236_v19 = vld [vmem:[%s1062_s28 + $0x18] sm:$0xff]  ;;  %s839_s8 = scalar_lea.vmem %s838_s7, 1024  ;;  %p840_p11 = scmp.lt.s32.totalorder %s1094_s29, %s838_s7 }
  0x4f   : > { %640 = vmatprep.subr.mxu0 %v249_v3  ;;  %677 = vmatpush3.msra.mxu1 %v250_v2  ;;  %v585_v49 = vld [vmem:[%s1137_s1] ss:$0 sm:$0xff]  ;;  %p836_p9 = pneg %p835_p7  ;;  %p841_p12 = scmp.lt.s32.totalorder %s839_s8, %s833_s25 }
  0x50   : > { %641 = vmatpush3.msra.mxu0 %v249_v3  ;;  %678 = vmatprep.subr.mxu1 %v249_v3  ;;  %v586_v52 = vld [vmem:[%s1138_s2] ss:$0 sm:$0xff] }
  0x51   : > { %642 = vmatprep.subr.mxu0 %v248_v5  ;;  %679 = vmatpush3.msra.mxu1 %v249_v3  ;;  %p842_p13 = por %p841_p12, %p840_p11 }
  0x52   : > { %643 = vmatpush3.msra.mxu0 %v248_v5  ;;  %680 = vmatprep.subr.mxu1 %v248_v5 }
  0x53   : > { %644 = vmatprep.subr.mxu0 %v247_v6  ;;  %681 = vmatpush3.msra.mxu1 %v248_v5  ;;  %p843_p0 = pnand %p842_p13, %p836_p9 }
  0x54   : > { %645 = vmatpush3.msra.mxu0 %v247_v6  ;;  %682 = vmatprep.subr.mxu1 %v247_v6 }
  0x55   : > { %646 = vmatprep.subr.mxu0 %v246_v7  ;;  %683 = vmatpush3.msra.mxu1 %v247_v6 }
  0x56   : > { %647 = vmatpush3.msra.mxu0 %v246_v7  ;;  %684 = vmatprep.subr.mxu1 %v246_v7 }
  0x57   : > { %648 = vmatprep.subr.mxu0 %v245_v8  ;;  %685 = vmatpush3.msra.mxu1 %v246_v7 }
  0x58   : > { %649 = vmatpush3.msra.mxu0 %v245_v8  ;;  %686 = vmatprep.subr.mxu1 %v245_v8 }
  0x59   : > { %650 = vmatprep.subr.mxu0 %v244_v9  ;;  %687 = vmatpush3.msra.mxu1 %v245_v8 }
  0x5a   : > { %651 = vmatpush3.msra.mxu0 %v244_v9  ;;  %688 = vmatprep.subr.mxu1 %v244_v9 }
  0x5b   : > { %652 = vmatprep.subr.mxu0 %v243_v10  ;;  %689 = vmatpush3.msra.mxu1 %v244_v9 }
  0x5c   : > { %653 = vmatpush3.msra.mxu0 %v243_v10  ;;  %690 = vmatprep.subr.mxu1 %v243_v10 }
  0x5d   : > { %654 = vmatprep.subr.mxu0 %v242_v11  ;;  %691 = vmatpush3.msra.mxu1 %v243_v10 }
  0x5e   : > { %655 = vmatpush3.msra.mxu0 %v242_v11  ;;  %692 = vmatprep.subr.mxu1 %v242_v11 }
  0x5f   : > { %656 = vmatprep.subr.mxu0 %v241_v12  ;;  %693 = vmatpush3.msra.mxu1 %v242_v11 }
  0x60   : > { %657 = vmatpush3.msra.mxu0 %v241_v12  ;;  %694 = vmatprep.subr.mxu1 %v241_v12 }
  0x61   : > { %658 = vmatprep.subr.mxu0 %v240_v13  ;;  %695 = vmatpush3.msra.mxu1 %v241_v12 }
  0x62   : > { %659 = vmatpush3.msra.mxu0 %v240_v13  ;;  %696 = vmatprep.subr.mxu1 %v240_v13 }
  0x63   : > { %660 = vmatprep.subr.mxu0 %v239_v14  ;;  %697 = vmatpush3.msra.mxu1 %v240_v13 }
  0x64   : > { %661 = vmatpush3.msra.mxu0 %v239_v14  ;;  %698 = vmatprep.subr.mxu1 %v239_v14 }
  0x65   : > { %662 = vmatprep.subr.mxu0 %v238_v15  ;;  %699 = vmatpush3.msra.mxu1 %v239_v14 }
  0x66   : > { %663 = vmatpush3.msra.mxu0 %v238_v15  ;;  %700 = vmatprep.subr.mxu1 %v238_v15 }
  0x67   : > { %664 = vmatprep.subr.mxu0 %v237_v16  ;;  %701 = vmatpush3.msra.mxu1 %v238_v15 }
  0x68   : > { %665 = vmatpush3.msra.mxu0 %v237_v16  ;;  %702 = vmatprep.subr.mxu1 %v237_v16 }
  0x69   : > { %667 = vmatmul.mubr.f32.vlgmr.msra.gmra.mxu0 %v234_v17  ;;  %703 = vmatpush3.msra.mxu1 %v237_v16 }
  0x6a   : > { %669 = vmatprep.mubr.f32.mxu0 %v235_v18 }
  0x6d   : > { %670 = vmatmul.mubr.f32.gmra.mxu0 %v236_v19 }
 0x129   : > { %v668_v20 = vpop.f32.mrf.mxu0 }
 0x12a   : > { %v339_v21 = vmul.f32 0.03125, %v668_v20 }
 0x12b   : > { %v319_v22 = vpop.f32.mrf.mxu0 }
 0x12c   : > { %v338_v23 = vmul.f32 0.03125, %v319_v22  ;;  %v343_v24 = vsub.f32 %v234_v17, %v339_v21 }
 0x12d   : > { %v671_v25 = vpop.f32.mrf.mxu0 }
 0x12e   : > { %v341_v26 = vmul.f32 0.03125, %v671_v25  ;;  %v342_v27 = vsub.f32 %v1073_v4, %v338_v23  ;;  %v347_v32 = vmul.f32 %v343_v24, %v343_v24 }
 0x12f   : > { %v329_v28 = vpop.f32.mrf.mxu0 }
 0x130   : > { %v340_v29 = vmul.f32 0.03125, %v329_v28  ;;  %v346_v30 = vmul.f32 %v342_v27, %v342_v27  ;;  %v345_v31 = vsub.f32 %v236_v19, %v341_v26 }
 0x132   : > { %v344_v33 = vsub.f32 %v235_v18, %v340_v29  ;;  %704 = vmatprep.mubr.f32.mxu1 %v346_v30  ;;  %v349_v35 = vmul.f32 %v345_v31, %v345_v31 }
 0x133   : > { %705 = vmatmul.mubr.f32.vlgmr.msra.gmra.mxu1 %v347_v32 }
 0x134   : > { %v348_v34 = vmul.f32 %v344_v33, %v344_v33 }
 0x136   : > { %707 = vmatprep.mubr.f32.mxu1 %v348_v34 }
 0x137   : > { %708 = vmatmul.mubr.f32.gmra.mxu1 %v349_v35 }
 0x1f3   : > { %v706_v36 = vpop.f32.mrf.mxu1 }
 0x1f4   : > { %v436_v37 = vmul.f32 0.03125, %v706_v36 }
 0x1f5   : > { %v416_v38 = vpop.f32.mrf.mxu1 }
 0x1f6   : > { %v440_v39 = vadd.f32 1e-05, %v436_v37  ;;  %v435_v40 = vmul.f32 0.03125, %v416_v38 }
 0x1f7   : > { %v709_v41 = vpop.f32.mrf.mxu1 }
 0x1f8   : > { %771 = vrsqrt.f32 %v440_v39  ;;  %v439_v42 = vadd.f32 1e-05, %v435_v40  ;;  %v438_v43 = vmul.f32 0.03125, %v709_v41 }
 0x1f9   : > { %v426_v44 = vpop.f32.mrf.mxu1 }
 0x1fa   : > { %773 = vrsqrt.f32 %v439_v42  ;;  %v442_v45 = vadd.f32 1e-05, %v438_v43  ;;  %v437_v46 = vmul.f32 0.03125, %v426_v44 }
 0x1fc   : > { %775 = vrsqrt.f32 %v442_v45  ;;  %v441_v47 = vadd.f32 1e-05, %v437_v46 }
 0x1fe   : > { %777 = vrsqrt.f32 %v441_v47 }
 0x205   : > { %v772_v48 = vpop.eup %771 }
 0x206   : > { %v448_v50 = vmul.f32 %v772_v48, %v343_v24 }
 0x207   : > { %v774_v51 = vpop.eup %773 }
 0x208   : > { %v459_v53 = vmul.f32 %v585_v49, %v448_v50  ;;  %v447_v54 = vmul.f32 %v774_v51, %v342_v27 }
 0x209   : > { %v776_v55 = vpop.eup %775 }
 0x20a   : > { %v470_v56 = vadd.f32 %v586_v52, %v459_v53  ;;  %v458_v57 = vmul.f32 %v585_v49, %v447_v54  ;;  %v450_v58 = vmul.f32 %v776_v55, %v345_v31 }
 0x20b   : > { %v778_v59 = vpop.eup %777 }
 0x20c   : > { %474 = vst [vmem:[%s230_s24 + $0x8] sm:$0xff] %v470_v56  ;;  %v469_v60 = vadd.f32 %v586_v52, %v458_v57  ;;  %v461_v61 = vmul.f32 %v585_v49, %v450_v58  ;;  %v449_v62 = vmul.f32 %v778_v59, %v344_v33 }
 0x20e   : > { %473 = vst [vmem:[%s230_s24] sm:$0xff] %v469_v60  ;;  %v472_v63 = vadd.f32 %v586_v52, %v461_v61  ;;  %v460_v0 = vmul.f32 %v585_v49, %v449_v62 }
 0x210   : > { %476 = vst [vmem:[%s230_s24 + $0x18] sm:$0xff] %v472_v63  ;;  %v471_v1 = vadd.f32 %v586_v52, %v460_v0 }
 0x212   : > { %475 = vst [vmem:[%s230_s24 + $0x10] sm:$0xff] %v471_v1 }
 0x213   : > { %846 = shalt.err (!%p843_p0)
}
 0x214   : > { %s847_s12 = scalar_lea.hbm %s1092_s11, 512  ;;  %s851_s23 = scalar_lea.hbm %s1140_s4, 2048 }
 0x215   : > { %p848_p5 = scmp.ne.s32.totalorder %s1092_s11, %s847_s12  ;;  %p852_p4 = scmp.lt.s32.totalorder %s1092_s11, %s1140_s4 }
 0x216   : > { %p853_p6 = scmp.lt.s32.totalorder %s851_s23, %s847_s12 }
 0x217   : > { %p849_p2 = pnand %p848_p5, %p1156_p10 }
 0x218   : > { %p854_p8 = por %p853_p6, %p852_p4 }
 0x219   : > { %p850_p1 = pneg %p849_p2 }
 0x21b   : > { %p855_p3 = pnand %p854_p8, %p850_p1 }
 0x21d   : > { %858 = shalt.err (!%p855_p3)
}
 0x21e   : > { %s908_s24 = smov 128   ;;  %s909_s26 = smov 8  }
 0x21f   : > { %716 = dma.vmem_to_hbm [thread:$0]  (%p1156_p10), %s1094_s29, 512, %s1092_s11, %s478_s20, %s908_s24, %s908_s24, %s909_s26  }
 0x220 PF: > { %p733_p7 = scmp.ge.s32.totalorder %s901_s18, 2  ;;  %s506_s13 = sand.u32 1, %s889_s15  }
 0x221   : > { %p1157_p9 = scmp.ne.s32.totalorder %s1146_s22, 0  ;;  %s507_s14 = scalar_lea.sflag [#allocation4], %s506_s13 }
 0x223   : > { %p727_p11 = pnand %p733_p7, %p1157_p9 }
 0x225   : > { %p728_p12 = pneg %p727_p11 }
 0x227   : > { %884 = dma.done.wait (%p728_p12), %s507_s14, 512  }
 0x228   : > { %886 = vsyncadd (%p728_p12), %s507_s14, 4294966784  ;;  %p18_p13 = scmp.ge.s32.totalorder %s988_s27, 6   ;;  %s1158_s15 = smov %s893_s16 }
 0x229   : > { %s1159_s16 = smov %s897_s17  ;;  %s1160_s17 = smov %s1008_s9 }
 0x22a   : > { %s1161_s18 = smov %s988_s27  ;;  %20 = sbr.rel (!%p18_p13) target bundleno = 6 (0x6), region = 85 }
 0x22f   :  { %512 = vsyncpa [#allocation3], 1 }
 0x230   :  { %514 = vsyncpa [#allocation3 + $0x1], 1 }
 0x231   :  { %515 = vsyncpa [#allocation6], 1 }
 0x232   :  { %516 = vsyncpa [#allocation4], 1 }
 0x233   :  { %518 = vsyncpa [#allocation4 + $0x1], 1 }

</bundles_post_ra>
